<compile_context>
chip_gen: v7x
topology: tpu7x:2x2x1
jax: 0.10.0
libtpu: 0.0.40
codegen_flags: <defaults>
</compile_context>

<pallas_src>
import functools
import math

import jax
import jax.numpy as jnp
from jax.experimental import pallas as pl
from jax.experimental.pallas import tpu as pltpu


# -----------------------------------------------------------------------------
# Kernel: one grid step == one block of `block_b` batch elements.
# -----------------------------------------------------------------------------
def encoder_layer_kernel(num_heads, dim_key, dim_value,
                         lens_ref, npm_ref,                 # tiny per-block aux
                         x_ref, wqkv_ref, bqkv_ref, wo_ref,
                         w1_ref, b1_ref, w2_ref, dvec_ref,
                         out_ref, attn_ref):
    H, dk, dv = num_heads, dim_key, dim_value
    Bb, T, D = x_ref.shape
    hdk = H * dk

    # ---- masks (built from tiny O(block_b) / O(block_b*T) inputs, no loop) -----
    len3 = lens_ref[0]                                       # (Bb, 1, 1) int32
    kpos = jax.lax.broadcasted_iota(jnp.int32, (Bb, 1, T), 2)
    # additive key-padding mask; finite -1e30 avoids inf-inf NaN on padded rows
    add_mask = jnp.where(kpos < len3, 0.0, -1e30)            # (Bb, 1, T) f32
    add_mask_h = jnp.concatenate([add_mask] * H, axis=0)     # (H*Bb, 1, T)
    npm = npm_ref[0]                                         # (Bb*T, 1) f32

    # ---- fused Q/K/V projection: one bf16 MXU pass, f32 accumulation -----------
    x2 = x_ref[...].reshape(Bb * T, D).astype(jnp.float32)   # folded row space
    qkv = jnp.dot(x2.astype(jnp.bfloat16), wqkv_ref[...],
                  preferred_element_type=jnp.float32) + bqkv_ref[...]
    qkv_bf = qkv.astype(jnp.bfloat16)

    # ---- head-major batch fold: (H*Bb, T, d), leading index = h*Bb + b ---------
    # (leading-axis concat of leading-dim reshapes only: safe Mosaic ops)
    q_all = jnp.concatenate(
        [qkv_bf[:, h * dk:(h + 1) * dk].reshape(Bb, T, dk) for h in range(H)],
        axis=0)
    k_all = jnp.concatenate(
        [qkv_bf[:, hdk + h * dk: hdk + (h + 1) * dk].reshape(Bb, T, dk)
         for h in range(H)], axis=0)
    v_all = jnp.concatenate(
        [qkv_bf[:, 2 * hdk + h * dv: 2 * hdk + (h + 1) * dv].reshape(Bb, T, dv)
         for h in range(H)], axis=0)

    # ---- single batched scaled-dot-product attention over all heads ------------
    inv_temp = 1.0 / math.sqrt(dk)
    s = jnp.einsum('bqd,bkd->bqk', q_all, k_all,
                   preferred_element_type=jnp.float32) * inv_temp + add_mask_h
    s = s - jnp.max(s, axis=-1, keepdims=True)
    e = jnp.exp(s)
    # exact reciprocal: these probabilities are also RETURNED as a module output
    p = e * pl.reciprocal(jnp.sum(e, axis=-1, keepdims=True))
    # one store of all heads' probabilities per grid step (bf16 writeback)
    attn_ref[...] = p.reshape(H, Bb, T, T).astype(attn_ref.dtype)

    ctx = jnp.einsum('bqk,bkd->bqd', p.astype(jnp.bfloat16), v_all,
                     preferred_element_type=jnp.float32)      # (H*Bb, T, dv)
    ctx_bf = ctx.astype(jnp.bfloat16)
    # re-interleave heads into the feature dim for ONE fused output projection
    ctx2 = jnp.concatenate([ctx_bf[h * Bb:(h + 1) * Bb] for h in range(H)],
                           axis=-1).reshape(Bb * T, H * dv)

    attn_out = jnp.dot(ctx2, wo_ref[...],
                       preferred_element_type=jnp.float32) + dvec_ref[0:1, :]

    def layer_norm(t, g, b):
        mu = jnp.mean(t, axis=-1, keepdims=True)
        var = jnp.mean(jnp.square(t - mu), axis=-1, keepdims=True)
        return (t - mu) * jax.lax.rsqrt(var + 1e-5) * g + b

    # MultiHeadAttention: residual + LayerNorm, then non_pad_mask
    o1 = layer_norm(attn_out + x2, dvec_ref[1:2, :], dvec_ref[2:3, :]) * npm

    # PositionwiseFeedForwardWithConv: two 1x1 convs == per-row linears (bf16 MXU)
    f = jnp.maximum(jnp.dot(o1.astype(jnp.bfloat16), w1_ref[...],
                            preferred_element_type=jnp.float32) + b1_ref[...], 0.0)
    f = jnp.dot(f.astype(jnp.bfloat16), w2_ref[...],
                preferred_element_type=jnp.float32) + dvec_ref[3:4, :]
    o2 = layer_norm(f + o1, dvec_ref[4:5, :], dvec_ref[5:6, :]) * npm

    out_ref[0] = o2.astype(out_ref.dtype)                     # (Bb*T, D) row-space store


# -----------------------------------------------------------------------------
# Wrapper
# -----------------------------------------------------------------------------
def encoder_layer(params, x, lengths, *, num_heads, dim_key, dim_value,
                  block_b=None):
    B, T, D = x.shape
    if block_b is None:
        # >= 2 grid steps so the "parallel" batch axis can use both v7x TCs;
        # at production sizes pick block_b so block_b*T >= 256 as well.
        block_b = B // 2 if (B >= 2 and B % 2 == 0) else B
    assert B % block_b == 0, "batch must be divisible by the batch block"
    NB = B // block_b
    H, dk, dv = num_heads, dim_key, dim_value

    (wq_t, bq, wk_t, bk, wv_t, bv, wo_t, bo,
     ln1g, ln1b, w1_t, b1, w2_t, b2, ln2g, ln2b) = params
    dim_inner = w1_t.shape[1]

    # Fused QKV weights/biases; small (1, D) vectors packed into one (6, D) operand.
    wqkv = jnp.concatenate([wq_t, wk_t, wv_t], axis=1).astype(jnp.bfloat16)
    bqkv = jnp.concatenate([bq, bk, bv], axis=1)                       # f32
    dvec = jnp.concatenate([bo, ln1g, ln1b, b2, ln2g, ln2b], axis=0)   # (6, D) f32
    wo_b = wo_t.astype(jnp.bfloat16)
    w1_b = w1_t.astype(jnp.bfloat16)
    w2_b = w2_t.astype(jnp.bfloat16)

    # Tiny auxiliary inputs (O(B) / O(B*T)) replacing the old (B,T,T) mask stream
    # and the in-kernel per-batch Python loop.
    lens4 = lengths.astype(jnp.int32).reshape(NB, block_b, 1, 1)
    t_idx = jnp.arange(T, dtype=jnp.int32)
    npm_rows = ((t_idx[None, :] < lengths[:, None]).astype(jnp.float32)
                .reshape(NB, block_b * T, 1))

    kern = functools.partial(encoder_layer_kernel, H, dk, dv)

    def const_spec(shape):
        n = len(shape)
        return pl.BlockSpec(shape, lambda g, _n=n: (0,) * _n)

    grid_spec = pltpu.PrefetchScalarGridSpec(
        num_scalar_prefetch=0,
        grid=(NB,),
        in_specs=[
            pl.BlockSpec((1, block_b, 1, 1), lambda g: (g, 0, 0, 0)),     # lengths
            pl.BlockSpec((1, block_b * T, 1), lambda g: (g, 0, 0)),       # non-pad mask rows
            pl.BlockSpec((block_b, T, D), lambda g: (g, 0, 0)),           # enc_input
            const_spec(wqkv.shape), const_spec(bqkv.shape),
            const_spec(wo_b.shape),
            const_spec(w1_b.shape), const_spec(b1.shape), const_spec(w2_b.shape),
            const_spec(dvec.shape),
        ],
        out_specs=[
            pl.BlockSpec((1, block_b * T, D), lambda g: (g, 0, 0)),       # enc output rows
            pl.BlockSpec((H, block_b, T, T), lambda g: (0, g, 0, 0)),     # attn probs (bf16)
        ],
    )

    # VMEM budget from the actual block sizes (double-buffered) + headroom.
    qkv_cols = 2 * H * dk + H * dv
    blk_bytes = (block_b * T * D * 4          # x block
                 + block_b * T * D * 4        # enc-out block
                 + H * block_b * T * T * 2    # attn block (bf16)
                 + block_b * T * 4 + block_b * 4)
    w_bytes = (D * qkv_cols * 2 + H * dv * D * 2 + D * dim_inner * 2
               + dim_inner * D * 2 + qkv_cols * 4 + dim_inner * 4 + 6 * D * 4)
    vmem_limit = min(64 << 20, max(32 << 20, 2 * (blk_bytes + w_bytes) + (8 << 20)))

    cost = pl.CostEstimate(
        flops=(2 * B * T * D * qkv_cols
               + 2 * B * H * T * T * (dk + dv)
               + 2 * B * T * (H * dv) * D
               + 4 * B * T * D * dim_inner),
        transcendentals=B * H * T * T,
        bytes_accessed=(B * T * D * 4          # x
                        + w_bytes
                        + B * T * D * 4        # enc out
                        + H * B * T * T * 2    # attn (bf16)
                        + B * T * 4 + B * 4),
    )

    out, attn = pl.pallas_call(
        kern,
        grid_spec=grid_spec,
        out_shape=[
            jax.ShapeDtypeStruct((NB, block_b * T, D), x.dtype),
            jax.ShapeDtypeStruct((H, B, T, T), jnp.bfloat16),
        ],
        compiler_params=pltpu.CompilerParams(
            dimension_semantics=("parallel",),       # batch blocks independent
            vmem_limit_bytes=int(vmem_limit)),
        cost_estimate=cost,
    )(lens4, npm_rows, x, wqkv, bqkv, wo_b, w1_b, b1, w2_b, dvec)

    # (NB, block_b*T, D) -> (B, T, D); (H, B, T, T) -> (H*B, T, T) head-major.
    return out.reshape(B, T, D), attn.reshape(H * B, T, T)


# -----------------------------------------------------------------------------
# Pure-JAX reference (correctness check); masks built from lengths as in the
# ASR transformer (key-padding mask + non-pad mask).
# -----------------------------------------------------------------------------
def encoder_layer_ref(params, x, lengths, *, num_heads, dim_key, dim_value):
    (wq_t, bq, wk_t, bk, wv_t, bv, wo_t, bo,
     ln1g, ln1b, w1_t, b1, w2_t, b2, ln2g, ln2b) = params
    B, T, D = x.shape
    t_idx = jnp.arange(T)
    npm = (t_idx[None, :] < lengths[:, None]).astype(jnp.float32)[..., None]  # (B,T,1)
    key_pad = t_idx[None, None, :] >= lengths[:, None, None]                  # (B,1,T)

    q = (x @ wq_t + bq).reshape(B, T, num_heads, dim_key).transpose(2, 0, 1, 3)
    k = (x @ wk_t + bk).reshape(B, T, num_heads, dim_key).transpose(2, 0, 1, 3)
    v = (x @ wv_t + bv).reshape(B, T, num_heads, dim_value).transpose(2, 0, 1, 3)
    s = jnp.einsum('hbtd,hbsd->hbts', q, k) / math.sqrt(dim_key)
    s = jnp.where(key_pad[None], -1e30, s)
    p = jax.nn.softmax(s, axis=-1)
    ctx = jnp.einsum('hbts,hbsd->hbtd', p, v)
    ctx = ctx.transpose(1, 2, 0, 3).reshape(B, T, num_heads * dim_value)
    ao = ctx @ wo_t + bo

    def ln(t, g, b):
        mu = t.mean(-1, keepdims=True)
        var = ((t - mu) ** 2).mean(-1, keepdims=True)
        return (t - mu) / jnp.sqrt(var + 1e-5) * g + b

    o1 = ln(ao + x, ln1g, ln1b) * npm
    f = jnp.maximum(o1 @ w1_t + b1, 0.0)
    f = f @ w2_t + b2
    o2 = ln(f + o1, ln2g, ln2b) * npm
    return o2, p.reshape(num_heads * B, T, T)


# -----------------------------------------------------------------------------
# Main
# -----------------------------------------------------------------------------
if __name__ == "__main__":
    # module hyper-parameters (small)
    num_heads, dim_model, dim_inner = 4, 32, 64
    dim_key, dim_value = 8, 8
    B, T = 2, 8

    key = jax.random.PRNGKey(0)
    ks = jax.random.split(key, 24)

    std_qk = math.sqrt(2.0 / (dim_model + dim_key))
    std_v = math.sqrt(2.0 / (dim_model + dim_value))
    std_o = math.sqrt(2.0 / (num_heads * dim_value + dim_model))

    # weights stored pre-transposed so the kernel does x @ W_t directly
    wq_t = (jax.random.normal(ks[0], (num_heads * dim_key, dim_model)) * std_qk).T
    wk_t = (jax.random.normal(ks[1], (num_heads * dim_key, dim_model)) * std_qk).T
    wv_t = (jax.random.normal(ks[2], (num_heads * dim_value, dim_model)) * std_v).T
    wo_t = (jax.random.normal(ks[3], (dim_model, num_heads * dim_value)) * std_o).T
    bq = jax.random.normal(ks[4], (1, num_heads * dim_key)) * 0.02
    bk = jax.random.normal(ks[5], (1, num_heads * dim_key)) * 0.02
    bv = jax.random.normal(ks[6], (1, num_heads * dim_value)) * 0.02
    bo = jax.random.normal(ks[7], (1, dim_model)) * 0.02
    ln1g = jnp.ones((1, dim_model), jnp.float32)
    ln1b = jnp.zeros((1, dim_model), jnp.float32)
    # 1x1 Conv1d weights (dim_inner, dim_model, 1) -> stored as (dim_model, dim_inner)
    w1_t = (jax.random.normal(ks[8], (dim_inner, dim_model)) * math.sqrt(1.0 / dim_model)).T
    b1 = jax.random.normal(ks[9], (1, dim_inner)) * 0.02
    w2_t = (jax.random.normal(ks[10], (dim_model, dim_inner)) * math.sqrt(1.0 / dim_inner)).T
    b2 = jax.random.normal(ks[11], (1, dim_model)) * 0.02
    ln2g = jnp.ones((1, dim_model), jnp.float32)
    ln2b = jnp.zeros((1, dim_model), jnp.float32)

    params = [p.astype(jnp.float32) for p in
              (wq_t, bq, wk_t, bk, wv_t, bv, wo_t, bo,
               ln1g, ln1b, w1_t, b1, w2_t, b2, ln2g, ln2b)]

    # inputs: second batch element has 2 padded frames
    x = jax.random.normal(ks[12], (B, T, dim_model), jnp.float32)
    lengths = jnp.array([T, T - 2], jnp.int32)

    enc_out, attn = encoder_layer(params, x, lengths,
                                  num_heads=num_heads, dim_key=dim_key,
                                  dim_value=dim_value)
    enc_out = jax.block_until_ready(enc_out)
    attn = jax.block_until_ready(attn)

    ref_out, ref_attn = encoder_layer_ref(params, x, lengths,
                                          num_heads=num_heads, dim_key=dim_key,
                                          dim_value=dim_value)

    assert enc_out.shape == (B, T, dim_model)
    assert attn.shape == (num_heads * B, T, T)
    # tolerances account for bf16 MXU operands and bf16 attention writeback
    assert jnp.allclose(enc_out, ref_out, atol=3e-2, rtol=3e-2)
    assert jnp.allclose(attn.astype(jnp.float32), ref_attn, atol=2e-2, rtol=2e-2)

    print("KERNEL_OK")
</pallas_src>

<mosaic_0001>
module attributes {stable_mosaic.version = 11 : i64} {
  func.func @encoder_layer_kernel(%arg0: i32, %arg1: memref<1x1x1x1xi32, #tpu.memory_space<vmem>>, %arg2: memref<1x8x1xf32, #tpu.memory_space<vmem>>, %arg3: memref<1x8x32xf32, #tpu.memory_space<vmem>>, %arg4: memref<32x96xbf16, #tpu.memory_space<vmem>>, %arg5: memref<1x96xf32, #tpu.memory_space<vmem>>, %arg6: memref<32x32xbf16, #tpu.memory_space<vmem>>, %arg7: memref<32x64xbf16, #tpu.memory_space<vmem>>, %arg8: memref<1x64xf32, #tpu.memory_space<vmem>>, %arg9: memref<64x32xbf16, #tpu.memory_space<vmem>>, %arg10: memref<6x32xf32, #tpu.memory_space<vmem>>, %arg11: memref<1x8x32xf32, #tpu.memory_space<vmem>>, %arg12: memref<4x1x8x8xbf16, #tpu.memory_space<vmem>>) attributes {dimension_semantics = [#tpu.dimension_semantics<parallel>], iteration_bounds = array<i64: 2>, scalar_prefetch = 0 : i64, scratch_operands = 0 : i64, tpu.core_type = #tpu.core_type<tc>, window_params = [{transform_indices = @transform_0, window_bounds = array<i64: 1, 1, 1, 1>}, {transform_indices = @transform_1, window_bounds = array<i64: 1, 8, 1>}, {transform_indices = @transform_2, window_bounds = array<i64: 1, 8, 32>}, {pipeline_mode = #tpu.pipeline_mode<synchronous>, transform_indices = @transform_3, window_bounds = array<i64: 32, 96>}, {pipeline_mode = #tpu.pipeline_mode<synchronous>, transform_indices = @transform_4, window_bounds = array<i64: 1, 96>}, {pipeline_mode = #tpu.pipeline_mode<synchronous>, transform_indices = @transform_5, window_bounds = array<i64: 32, 32>}, {pipeline_mode = #tpu.pipeline_mode<synchronous>, transform_indices = @transform_6, window_bounds = array<i64: 32, 64>}, {pipeline_mode = #tpu.pipeline_mode<synchronous>, transform_indices = @transform_7, window_bounds = array<i64: 1, 64>}, {pipeline_mode = #tpu.pipeline_mode<synchronous>, transform_indices = @transform_8, window_bounds = array<i64: 64, 32>}, {pipeline_mode = #tpu.pipeline_mode<synchronous>, transform_indices = @transform_9, window_bounds = array<i64: 6, 32>}, {transform_indices = @transform_10, window_bounds = array<i64: 1, 8, 32>}, {transform_indices = @transform_11, window_bounds = array<i64: 4, 1, 8, 8>}]} {
    %c0 = arith.constant 0 : index
    %c0_0 = arith.constant 0 : index
    %c0_1 = arith.constant 0 : index
    %c0_2 = arith.constant 0 : index
    %0 = vector.load %arg1[%c0, %c0_0, %c0_1, %c0_2] : memref<1x1x1x1xi32, #tpu.memory_space<vmem>>, vector<1x1x1x1xi32>
    %1 = vector.shape_cast %0 : vector<1x1x1x1xi32> to vector<1x1x1xi32>
    %2 = tpu.iota {dimensions = array<i32: 2>} : vector<1x1x8xi32>
    %3 = vector.broadcast %1 : vector<1x1x1xi32> to vector<1x1x8xi32>
    %4 = arith.cmpi slt, %2, %3 : vector<1x1x8xi32>
    %cst = arith.constant 0.000000e+00 : f32
    %cst_3 = arith.constant -1.000000e+30 : f32
    %5 = vector.broadcast %cst : f32 to vector<1x1x8xf32>
    %6 = vector.broadcast %cst_3 : f32 to vector<1x1x8xf32>
    %7 = arith.select %4, %5, %6 : vector<1x1x8xi1>, vector<1x1x8xf32>
    %8 = tpu.concatenate %7, %7, %7, %7 in 0 : vector<1x1x8xf32>, vector<1x1x8xf32>, vector<1x1x8xf32>, vector<1x1x8xf32> -> vector<4x1x8xf32>
    %c0_4 = arith.constant 0 : index
    %c0_5 = arith.constant 0 : index
    %c0_6 = arith.constant 0 : index
    %9 = vector.load %arg2[%c0_4, %c0_5, %c0_6] : memref<1x8x1xf32, #tpu.memory_space<vmem>>, vector<1x8x1xf32>
    %10 = vector.shape_cast %9 : vector<1x8x1xf32> to vector<8x1xf32>
    %c0_7 = arith.constant 0 : index
    %c0_8 = arith.constant 0 : index
    %c0_9 = arith.constant 0 : index
    %11 = vector.load %arg3[%c0_7, %c0_8, %c0_9] : memref<1x8x32xf32, #tpu.memory_space<vmem>>, vector<1x8x32xf32>
    %12 = vector.shape_cast %11 : vector<1x8x32xf32> to vector<8x32xf32>
    %13 = arith.truncf %12 : vector<8x32xf32> to vector<8x32xbf16>
    %c0_10 = arith.constant 0 : index
    %c0_11 = arith.constant 0 : index
    %14 = vector.load %arg4[%c0_10, %c0_11] : memref<32x96xbf16, #tpu.memory_space<vmem>>, vector<32x96xbf16>
    %cst_12 = arith.constant dense<0.000000e+00> : vector<8x96xf32>
    %15 = tpu.matmul %13, %14, %cst_12 {dimension_numbers = #tpu.dot_dimension_numbers<[1], [0], [0], [1], [0, 0, 1, 1], [], []>} : vector<8x32xbf16>, vector<32x96xbf16>, vector<8x96xf32> -> vector<8x96xf32>
    %c0_13 = arith.constant 0 : index
    %c0_14 = arith.constant 0 : index
    %16 = vector.load %arg5[%c0_13, %c0_14] : memref<1x96xf32, #tpu.memory_space<vmem>>, vector<1x96xf32>
    %17 = vector.broadcast %16 : vector<1x96xf32> to vector<8x96xf32>
    %18 = arith.addf %15, %17 : vector<8x96xf32>
    %19 = arith.truncf %18 : vector<8x96xf32> to vector<8x96xbf16>
    %20 = vector.extract_strided_slice %19 {offsets = [0, 0], sizes = [8, 8], strides = [1, 1]} : vector<8x96xbf16> to vector<8x8xbf16>
    %21 = vector.shape_cast %20 : vector<8x8xbf16> to vector<1x8x8xbf16>
    %22 = vector.extract_strided_slice %19 {offsets = [0, 8], sizes = [8, 8], strides = [1, 1]} : vector<8x96xbf16> to vector<8x8xbf16>
    %23 = vector.shape_cast %22 : vector<8x8xbf16> to vector<1x8x8xbf16>
    %24 = vector.extract_strided_slice %19 {offsets = [0, 16], sizes = [8, 8], strides = [1, 1]} : vector<8x96xbf16> to vector<8x8xbf16>
    %25 = vector.shape_cast %24 : vector<8x8xbf16> to vector<1x8x8xbf16>
    %26 = vector.extract_strided_slice %19 {offsets = [0, 24], sizes = [8, 8], strides = [1, 1]} : vector<8x96xbf16> to vector<8x8xbf16>
    %27 = vector.shape_cast %26 : vector<8x8xbf16> to vector<1x8x8xbf16>
    %28 = tpu.concatenate %21, %23, %25, %27 in 0 : vector<1x8x8xbf16>, vector<1x8x8xbf16>, vector<1x8x8xbf16>, vector<1x8x8xbf16> -> vector<4x8x8xbf16>
    %29 = vector.extract_strided_slice %19 {offsets = [0, 32], sizes = [8, 8], strides = [1, 1]} : vector<8x96xbf16> to vector<8x8xbf16>
    %30 = vector.shape_cast %29 : vector<8x8xbf16> to vector<1x8x8xbf16>
    %31 = vector.extract_strided_slice %19 {offsets = [0, 40], sizes = [8, 8], strides = [1, 1]} : vector<8x96xbf16> to vector<8x8xbf16>
    %32 = vector.shape_cast %31 : vector<8x8xbf16> to vector<1x8x8xbf16>
    %33 = vector.extract_strided_slice %19 {offsets = [0, 48], sizes = [8, 8], strides = [1, 1]} : vector<8x96xbf16> to vector<8x8xbf16>
    %34 = vector.shape_cast %33 : vector<8x8xbf16> to vector<1x8x8xbf16>
    %35 = vector.extract_strided_slice %19 {offsets = [0, 56], sizes = [8, 8], strides = [1, 1]} : vector<8x96xbf16> to vector<8x8xbf16>
    %36 = vector.shape_cast %35 : vector<8x8xbf16> to vector<1x8x8xbf16>
    %37 = tpu.concatenate %30, %32, %34, %36 in 0 : vector<1x8x8xbf16>, vector<1x8x8xbf16>, vector<1x8x8xbf16>, vector<1x8x8xbf16> -> vector<4x8x8xbf16>
    %38 = vector.extract_strided_slice %19 {offsets = [0, 64], sizes = [8, 8], strides = [1, 1]} : vector<8x96xbf16> to vector<8x8xbf16>
    %39 = vector.shape_cast %38 : vector<8x8xbf16> to vector<1x8x8xbf16>
    %40 = vector.extract_strided_slice %19 {offsets = [0, 72], sizes = [8, 8], strides = [1, 1]} : vector<8x96xbf16> to vector<8x8xbf16>
    %41 = vector.shape_cast %40 : vector<8x8xbf16> to vector<1x8x8xbf16>
    %42 = vector.extract_strided_slice %19 {offsets = [0, 80], sizes = [8, 8], strides = [1, 1]} : vector<8x96xbf16> to vector<8x8xbf16>
    %43 = vector.shape_cast %42 : vector<8x8xbf16> to vector<1x8x8xbf16>
    %44 = vector.extract_strided_slice %19 {offsets = [0, 88], sizes = [8, 8], strides = [1, 1]} : vector<8x96xbf16> to vector<8x8xbf16>
    %45 = vector.shape_cast %44 : vector<8x8xbf16> to vector<1x8x8xbf16>
    %46 = tpu.concatenate %39, %41, %43, %45 in 0 : vector<1x8x8xbf16>, vector<1x8x8xbf16>, vector<1x8x8xbf16>, vector<1x8x8xbf16> -> vector<4x8x8xbf16>
    "tpu.trace_start"() <{level = 10 : i32, message = "bqd,bkd->bqk"}> : () -> ()
    %cst_15 = arith.constant dense<0.000000e+00> : vector<4x8x8xf32>
    %47 = tpu.matmul %28, %37, %cst_15 {dimension_numbers = #tpu.dot_dimension_numbers<[2], [2], [1], [1], [0, 0, 0, 1, 1, 1], [0], [0]>} : vector<4x8x8xbf16>, vector<4x8x8xbf16>, vector<4x8x8xf32> -> vector<4x8x8xf32>
    "tpu.trace_stop"() : () -> ()
    %cst_16 = arith.constant 0.353553385 : f32
    %48 = vector.broadcast %cst_16 : f32 to vector<4x8x8xf32>
    %49 = arith.mulf %47, %48 : vector<4x8x8xf32>
    %50 = vector.broadcast %8 : vector<4x1x8xf32> to vector<4x8x8xf32>
    %51 = arith.addf %49, %50 : vector<4x8x8xf32>
    %cst_17 = arith.constant dense<0xFF800000> : vector<4x8xf32>
    %52 = vector.multi_reduction <maximumf>, %51, %cst_17 [2] : vector<4x8x8xf32> to vector<4x8xf32>
    %53 = vector.shape_cast %52 : vector<4x8xf32> to vector<4x8x1xf32>
    %54 = vector.broadcast %53 : vector<4x8x1xf32> to vector<4x8x8xf32>
    %55 = arith.subf %51, %54 : vector<4x8x8xf32>
    %56 = math.exp %55 : vector<4x8x8xf32>
    %cst_18 = arith.constant dense<0.000000e+00> : vector<4x8xf32>
    %57 = vector.multi_reduction <add>, %56, %cst_18 [2] : vector<4x8x8xf32> to vector<4x8xf32>
    %58 = vector.shape_cast %57 : vector<4x8xf32> to vector<4x8x1xf32>
    %59 = tpu.reciprocal %58 : vector<4x8x1xf32> -> vector<4x8x1xf32>
    %60 = vector.broadcast %59 : vector<4x8x1xf32> to vector<4x8x8xf32>
    %61 = arith.mulf %56, %60 : vector<4x8x8xf32>
    %62 = vector.shape_cast %61 : vector<4x8x8xf32> to vector<4x1x8x8xf32>
    %63 = arith.truncf %62 : vector<4x1x8x8xf32> to vector<4x1x8x8xbf16>
    %c0_19 = arith.constant 0 : index
    %c0_20 = arith.constant 0 : index
    %c0_21 = arith.constant 0 : index
    %c0_22 = arith.constant 0 : index
    %64 = vector.load %arg12[%c0_19, %c0_20, %c0_21, %c0_22] : memref<4x1x8x8xbf16, #tpu.memory_space<vmem>>, vector<4x1x8x8xbf16>
    tpu.vector_store %arg12[%c0_19, %c0_20, %c0_21, %c0_22], %63 {strides = array<i32>} : memref<4x1x8x8xbf16, #tpu.memory_space<vmem>>, vector<4x1x8x8xbf16>,
    %65 = arith.truncf %61 : vector<4x8x8xf32> to vector<4x8x8xbf16>
    "tpu.trace_start"() <{level = 10 : i32, message = "bqk,bkd->bqd"}> : () -> ()
    %cst_23 = arith.constant dense<0.000000e+00> : vector<4x8x8xf32>
    %66 = tpu.matmul %65, %46, %cst_23 {dimension_numbers = #tpu.dot_dimension_numbers<[2], [1], [1], [2], [0, 0, 0, 1, 1, 2], [0], [0]>} : vector<4x8x8xbf16>, vector<4x8x8xbf16>, vector<4x8x8xf32> -> vector<4x8x8xf32>
    "tpu.trace_stop"() : () -> ()
    %67 = arith.truncf %66 : vector<4x8x8xf32> to vector<4x8x8xbf16>
    %68 = vector.extract_strided_slice %67 {offsets = [0, 0, 0], sizes = [1, 8, 8], strides = [1, 1, 1]} : vector<4x8x8xbf16> to vector<1x8x8xbf16>
    %69 = vector.extract_strided_slice %67 {offsets = [1, 0, 0], sizes = [1, 8, 8], strides = [1, 1, 1]} : vector<4x8x8xbf16> to vector<1x8x8xbf16>
    %70 = vector.extract_strided_slice %67 {offsets = [2, 0, 0], sizes = [1, 8, 8], strides = [1, 1, 1]} : vector<4x8x8xbf16> to vector<1x8x8xbf16>
    %71 = vector.extract_strided_slice %67 {offsets = [3, 0, 0], sizes = [1, 8, 8], strides = [1, 1, 1]} : vector<4x8x8xbf16> to vector<1x8x8xbf16>
    %72 = tpu.concatenate %68, %69, %70, %71 in 2 : vector<1x8x8xbf16>, vector<1x8x8xbf16>, vector<1x8x8xbf16>, vector<1x8x8xbf16> -> vector<1x8x32xbf16>
    %73 = vector.shape_cast %72 : vector<1x8x32xbf16> to vector<8x32xbf16>
    %c0_24 = arith.constant 0 : index
    %c0_25 = arith.constant 0 : index
    %74 = vector.load %arg6[%c0_24, %c0_25] : memref<32x32xbf16, #tpu.memory_space<vmem>>, vector<32x32xbf16>
    %cst_26 = arith.constant dense<0.000000e+00> : vector<8x32xf32>
    %75 = tpu.matmul %73, %74, %cst_26 {dimension_numbers = #tpu.dot_dimension_numbers<[1], [0], [0], [1], [0, 0, 1, 1], [], []>} : vector<8x32xbf16>, vector<32x32xbf16>, vector<8x32xf32> -> vector<8x32xf32>
    %c0_27 = arith.constant 0 : index
    %c0_28 = arith.constant 0 : index
    %76 = vector.load %arg10[%c0_27, %c0_28] : memref<6x32xf32, #tpu.memory_space<vmem>>, vector<1x32xf32>
    %77 = vector.broadcast %76 : vector<1x32xf32> to vector<8x32xf32>
    %78 = arith.addf %75, %77 : vector<8x32xf32>
    %79 = arith.addf %78, %12 : vector<8x32xf32>
    %c1 = arith.constant 1 : index
    %c0_29 = arith.constant 0 : index
    %80 = vector.load %arg10[%c1, %c0_29] : memref<6x32xf32, #tpu.memory_space<vmem>>, vector<1x32xf32>
    %c2 = arith.constant 2 : index
    %c0_30 = arith.constant 0 : index
    %81 = vector.load %arg10[%c2, %c0_30] : memref<6x32xf32, #tpu.memory_space<vmem>>, vector<1x32xf32>
    %cst_31 = arith.constant dense<0.000000e+00> : vector<8xf32>
    %82 = vector.multi_reduction <add>, %79, %cst_31 [1] : vector<8x32xf32> to vector<8xf32>
    %83 = vector.shape_cast %82 : vector<8xf32> to vector<8x1xf32>
    %cst_32 = arith.constant 3.200000e+01 : f32
    %84 = vector.broadcast %cst_32 : f32 to vector<8x1xf32>
    %85 = arith.divf %83, %84 : vector<8x1xf32>
    %86 = vector.broadcast %85 : vector<8x1xf32> to vector<8x32xf32>
    %87 = arith.subf %79, %86 : vector<8x32xf32>
    %88 = arith.mulf %87, %87 : vector<8x32xf32>
    %cst_33 = arith.constant dense<0.000000e+00> : vector<8xf32>
    %89 = vector.multi_reduction <add>, %88, %cst_33 [1] : vector<8x32xf32> to vector<8xf32>
    %90 = vector.shape_cast %89 : vector<8xf32> to vector<8x1xf32>
    %cst_34 = arith.constant 3.200000e+01 : f32
    %91 = vector.broadcast %cst_34 : f32 to vector<8x1xf32>
    %92 = arith.divf %90, %91 : vector<8x1xf32>
    %93 = vector.broadcast %85 : vector<8x1xf32> to vector<8x32xf32>
    %94 = arith.subf %79, %93 : vector<8x32xf32>
    %cst_35 = arith.constant 9.99999974E-6 : f32
    %95 = vector.broadcast %cst_35 : f32 to vector<8x1xf32>
    %96 = arith.addf %92, %95 : vector<8x1xf32>
    %97 = math.rsqrt %96 : vector<8x1xf32>
    %98 = vector.broadcast %97 : vector<8x1xf32> to vector<8x32xf32>
    %99 = arith.mulf %94, %98 : vector<8x32xf32>
    %100 = vector.broadcast %80 : vector<1x32xf32> to vector<8x32xf32>
    %101 = arith.mulf %99, %100 : vector<8x32xf32>
    %102 = vector.broadcast %81 : vector<1x32xf32> to vector<8x32xf32>
    %103 = arith.addf %101, %102 : vector<8x32xf32>
    %104 = vector.broadcast %10 : vector<8x1xf32> to vector<8x32xf32>
    %105 = arith.mulf %103, %104 : vector<8x32xf32>
    %106 = arith.truncf %105 : vector<8x32xf32> to vector<8x32xbf16>
    %c0_36 = arith.constant 0 : index
    %c0_37 = arith.constant 0 : index
    %107 = vector.load %arg7[%c0_36, %c0_37] : memref<32x64xbf16, #tpu.memory_space<vmem>>, vector<32x64xbf16>
    %cst_38 = arith.constant dense<0.000000e+00> : vector<8x64xf32>
    %108 = tpu.matmul %106, %107, %cst_38 {dimension_numbers = #tpu.dot_dimension_numbers<[1], [0], [0], [1], [0, 0, 1, 1], [], []>} : vector<8x32xbf16>, vector<32x64xbf16>, vector<8x64xf32> -> vector<8x64xf32>
    %c0_39 = arith.constant 0 : index
    %c0_40 = arith.constant 0 : index
    %109 = vector.load %arg8[%c0_39, %c0_40] : memref<1x64xf32, #tpu.memory_space<vmem>>, vector<1x64xf32>
    %110 = vector.broadcast %109 : vector<1x64xf32> to vector<8x64xf32>
    %111 = arith.addf %108, %110 : vector<8x64xf32>
    %cst_41 = arith.constant 0.000000e+00 : f32
    %112 = vector.broadcast %cst_41 : f32 to vector<8x64xf32>
    %113 = arith.maximumf %111, %112 : vector<8x64xf32>
    %114 = arith.truncf %113 : vector<8x64xf32> to vector<8x64xbf16>
    %c0_42 = arith.constant 0 : index
    %c0_43 = arith.constant 0 : index
    %115 = vector.load %arg9[%c0_42, %c0_43] : memref<64x32xbf16, #tpu.memory_space<vmem>>, vector<64x32xbf16>
    %cst_44 = arith.constant dense<0.000000e+00> : vector<8x32xf32>
    %116 = tpu.matmul %114, %115, %cst_44 {dimension_numbers = #tpu.dot_dimension_numbers<[1], [0], [0], [1], [0, 0, 1, 1], [], []>} : vector<8x64xbf16>, vector<64x32xbf16>, vector<8x32xf32> -> vector<8x32xf32>
    %c3 = arith.constant 3 : index
    %c0_45 = arith.constant 0 : index
    %117 = vector.load %arg10[%c3, %c0_45] : memref<6x32xf32, #tpu.memory_space<vmem>>, vector<1x32xf32>
    %118 = vector.broadcast %117 : vector<1x32xf32> to vector<8x32xf32>
    %119 = arith.addf %116, %118 : vector<8x32xf32>
    %120 = arith.addf %119, %105 : vector<8x32xf32>
    %c4 = arith.constant 4 : index
    %c0_46 = arith.constant 0 : index
    %121 = vector.load %arg10[%c4, %c0_46] : memref<6x32xf32, #tpu.memory_space<vmem>>, vector<1x32xf32>
    %c5 = arith.constant 5 : index
    %c0_47 = arith.constant 0 : index
    %122 = vector.load %arg10[%c5, %c0_47] : memref<6x32xf32, #tpu.memory_space<vmem>>, vector<1x32xf32>
    %cst_48 = arith.constant dense<0.000000e+00> : vector<8xf32>
    %123 = vector.multi_reduction <add>, %120, %cst_48 [1] : vector<8x32xf32> to vector<8xf32>
    %124 = vector.shape_cast %123 : vector<8xf32> to vector<8x1xf32>
    %cst_49 = arith.constant 3.200000e+01 : f32
    %125 = vector.broadcast %cst_49 : f32 to vector<8x1xf32>
    %126 = arith.divf %124, %125 : vector<8x1xf32>
    %127 = vector.broadcast %126 : vector<8x1xf32> to vector<8x32xf32>
    %128 = arith.subf %120, %127 : vector<8x32xf32>
    %129 = arith.mulf %128, %128 : vector<8x32xf32>
    %cst_50 = arith.constant dense<0.000000e+00> : vector<8xf32>
    %130 = vector.multi_reduction <add>, %129, %cst_50 [1] : vector<8x32xf32> to vector<8xf32>
    %131 = vector.shape_cast %130 : vector<8xf32> to vector<8x1xf32>
    %cst_51 = arith.constant 3.200000e+01 : f32
    %132 = vector.broadcast %cst_51 : f32 to vector<8x1xf32>
    %133 = arith.divf %131, %132 : vector<8x1xf32>
    %134 = vector.broadcast %126 : vector<8x1xf32> to vector<8x32xf32>
    %135 = arith.subf %120, %134 : vector<8x32xf32>
    %cst_52 = arith.constant 9.99999974E-6 : f32
    %136 = vector.broadcast %cst_52 : f32 to vector<8x1xf32>
    %137 = arith.addf %133, %136 : vector<8x1xf32>
    %138 = math.rsqrt %137 : vector<8x1xf32>
    %139 = vector.broadcast %138 : vector<8x1xf32> to vector<8x32xf32>
    %140 = arith.mulf %135, %139 : vector<8x32xf32>
    %141 = vector.broadcast %121 : vector<1x32xf32> to vector<8x32xf32>
    %142 = arith.mulf %140, %141 : vector<8x32xf32>
    %143 = vector.broadcast %122 : vector<1x32xf32> to vector<8x32xf32>
    %144 = arith.addf %142, %143 : vector<8x32xf32>
    %145 = vector.broadcast %10 : vector<8x1xf32> to vector<8x32xf32>
    %146 = arith.mulf %144, %145 : vector<8x32xf32>
    %c0_53 = arith.constant 0 : index
    %c0_54 = arith.constant 0 : index
    %c0_55 = arith.constant 0 : index
    %147 = vector.load %arg11[%c0_53, %c0_54, %c0_55] : memref<1x8x32xf32, #tpu.memory_space<vmem>>, vector<1x8x32xf32>
    %148 = vector.shape_cast %147 : vector<1x8x32xf32> to vector<8x32xf32>
    %149 = vector.shape_cast %146 : vector<8x32xf32> to vector<1x8x32xf32>
    tpu.vector_store %arg11[%c0_53, %c0_54, %c0_55], %149 {strides = array<i32>} : memref<1x8x32xf32, #tpu.memory_space<vmem>>, vector<1x8x32xf32>,
    return
  }
  func.func @transform_0(%arg0: i32) -> (i32, i32, i32, i32) {
    %c0_i32 = arith.constant 0 : i32
    %c0_i32_0 = arith.constant 0 : i32
    %c0_i32_1 = arith.constant 0 : i32
    %c0_i32_2 = arith.constant 0 : i32
    return %arg0, %c0_i32, %c0_i32_0, %c0_i32_1 : i32, i32, i32, i32
  }
  func.func @transform_1(%arg0: i32) -> (i32, i32, i32) {
    %c0_i32 = arith.constant 0 : i32
    %c0_i32_0 = arith.constant 0 : i32
    %c0_i32_1 = arith.constant 0 : i32
    return %arg0, %c0_i32, %c0_i32_0 : i32, i32, i32
  }
  func.func @transform_2(%arg0: i32) -> (i32, i32, i32) {
    %c0_i32 = arith.constant 0 : i32
    %c0_i32_0 = arith.constant 0 : i32
    %c0_i32_1 = arith.constant 0 : i32
    return %arg0, %c0_i32, %c0_i32_0 : i32, i32, i32
  }
  func.func @transform_3(%arg0: i32) -> (i32, i32) {
    %c0_i32 = arith.constant 0 : i32
    %c0_i32_0 = arith.constant 0 : i32
    %c0_i32_1 = arith.constant 0 : i32
    return %c0_i32, %c0_i32_0 : i32, i32
  }
  func.func @transform_4(%arg0: i32) -> (i32, i32) {
    %c0_i32 = arith.constant 0 : i32
    %c0_i32_0 = arith.constant 0 : i32
    %c0_i32_1 = arith.constant 0 : i32
    return %c0_i32, %c0_i32_0 : i32, i32
  }
  func.func @transform_5(%arg0: i32) -> (i32, i32) {
    %c0_i32 = arith.constant 0 : i32
    %c0_i32_0 = arith.constant 0 : i32
    %c0_i32_1 = arith.constant 0 : i32
    return %c0_i32, %c0_i32_0 : i32, i32
  }
  func.func @transform_6(%arg0: i32) -> (i32, i32) {
    %c0_i32 = arith.constant 0 : i32
    %c0_i32_0 = arith.constant 0 : i32
    %c0_i32_1 = arith.constant 0 : i32
    return %c0_i32, %c0_i32_0 : i32, i32
  }
  func.func @transform_7(%arg0: i32) -> (i32, i32) {
    %c0_i32 = arith.constant 0 : i32
    %c0_i32_0 = arith.constant 0 : i32
    %c0_i32_1 = arith.constant 0 : i32
    return %c0_i32, %c0_i32_0 : i32, i32
  }
  func.func @transform_8(%arg0: i32) -> (i32, i32) {
    %c0_i32 = arith.constant 0 : i32
    %c0_i32_0 = arith.constant 0 : i32
    %c0_i32_1 = arith.constant 0 : i32
    return %c0_i32, %c0_i32_0 : i32, i32
  }
  func.func @transform_9(%arg0: i32) -> (i32, i32) {
    %c0_i32 = arith.constant 0 : i32
    %c0_i32_0 = arith.constant 0 : i32
    %c0_i32_1 = arith.constant 0 : i32
    return %c0_i32, %c0_i32_0 : i32, i32
  }
  func.func @transform_10(%arg0: i32) -> (i32, i32, i32) {
    %c0_i32 = arith.constant 0 : i32
    %c0_i32_0 = arith.constant 0 : i32
    %c0_i32_1 = arith.constant 0 : i32
    return %arg0, %c0_i32, %c0_i32_0 : i32, i32, i32
  }
  func.func @transform_11(%arg0: i32) -> (i32, i32, i32, i32) {
    %c0_i32 = arith.constant 0 : i32
    %c0_i32_0 = arith.constant 0 : i32
    %c0_i32_1 = arith.constant 0 : i32
    %c0_i32_2 = arith.constant 0 : i32
    return %c0_i32, %arg0, %c0_i32_0, %c0_i32_1 : i32, i32, i32, i32
  }
}

</mosaic_0001>

<bundles_post_ra>
// kernel: tpu_custom_call.1
= control target key start
LH: loop header
LB: loop body
LE: loop exit
PB: predicated region body
PF: predicated region fallthrough
CT: control target
= control target key end

     0   :  { %s2259_s0 = inlined_call_operand.vmem [shape: s32[2,1,1,1], index: 0, kind: input, shape index: {}]   ;;  %s2260_s1 = inlined_call_operand.vmem [shape: f32[2,8,1], index: 1, kind: input, shape index: {}]   ;;  %s2261_s2 = inlined_call_operand.vmem [shape: f32[2,8,32], index: 2, kind: input, shape index: {}]   ;;  %s2262_s3 = inlined_call_operand.vmem [shape: bf16[32,96], index: 3, kind: input, shape index: {}]   ;;  %s2263_s4 = inlined_call_operand.hbm [shape: f32[1,96], index: 4, kind: input, shape index: {}]   ;;  %s2264_s5 = inlined_call_operand.vmem [shape: bf16[32,32], index: 5, kind: input, shape index: {}]   ;;  %s2265_s6 = inlined_call_operand.vmem [shape: bf16[32,64], index: 6, kind: input, shape index: {}]   ;;  %s2266_s7 = inlined_call_operand.vmem [shape: f32[1,64], index: 7, kind: input, shape index: {}]   ;;  %s2267_s8 = inlined_call_operand.vmem [shape: bf16[64,32], index: 8, kind: input, shape index: {}]   ;;  %s2268_s9 = inlined_call_operand.vmem [shape: f32[6,32], index: 9, kind: input, shape index: {}]   ;;  %s2269_s10 = inlined_call_operand.hbm [shape: f32[2,8,32], index: 10, kind: output, shape index: {0}]   ;;  %s2270_s11 = inlined_call_operand.hbm [shape: bf16[4,2,8,8], index: 11, kind: output, shape index: {1}]  }
   0x1   :  { %2275 = sst [smem:[#allocation12_spill]] %s2259_s0 }
   0x2   :  { %2276 = sst [smem:[#allocation13_spill]] %s2260_s1 }
   0x3   :  { %17 = vsyncpa [#allocation3], 0 }
   0x4   :  { %18 = vsyncpa [#allocation4], 0 }
   0x5   :  { %20 = vsyncpa [#allocation4 + $0x1], 0 }
   0x6   :  { %21 = vsyncpa [#allocation7], 0 }
   0x7   :  { %23 = vsyncpa [#allocation7 + $0x1], 0  ;;  %s1899_s17 = smov 0   ;;  %s1901_s18 = smov 0  }
   0x8   :  { %s1903_s19 = smov 0   ;;  %s1905_s20 = smov 0  }
   0x9 LB: > { %s1920_s21 = sadd.s32 4294967295, %s1820_s20   ;;  %s1433_s22 = sadd.s32 4294967294, %s1820_s20   ;;  %s1820_s20 = sphi %s1905_s20, %s2294_s20   ;;  %s1816_s19 = sphi %s1903_s19, %s2293_s19   ;;  %s1812_s18 = sphi %s1901_s18, %s2292_s18   ;;  %s1808_s17 = sphi %s1899_s17, %s2291_s17  }
   0xa   : > { %s1924_s23 = sadd.s32 1, %s1820_s20   ;;  %s261_s24 = sadd.s32 1, %s1816_s19 }
   0xb   : > { %s258_s25 = ssub.s32 %s1820_s20, %s1924_s23  ;;  %p271_p0 = scmp.ne.s32.totalorder %s1816_s19, %s1812_s18 }
   0xc   : > { %p259_p1 = scmp.eq.s32.totalorder %s258_s25, 0  ;;  %p272_p2 = scmp.eq.s32.totalorder %s1920_s21, 1 }
   0xd   : > { %p277_p3 = scmp.ne.s32.totalorder %s1812_s18, %s1808_s17  ;;  %p278_p4 = scmp.eq.s32.totalorder %s1433_s22, 1 }
   0xe   : > { %s1935_s26 = scalar_select %p259_p1, %s1816_s19, %s261_s24  }
   0xf   : > { %p1937_p5 = por %p272_p2, %p271_p0  ;;  %p1941_p6 = por %p278_p4, %p277_p3 }
  0x10   : > { %2277 = sst [smem:[#allocation11_spill]] %s1935_s26  ;;  %p1434_p7 = scmp.ge.s32.totalorder %s1820_s20, 1 }
  0x11   : > { %s2278_s27 = scalar_select %p1937_p5, 1, 0 }
  0x12   : > { %s2279_s28 = scalar_select %p1941_p6, 1, 0 }
  0x13   : > { %p311_p8 = scmp.lt.s32.totalorder %s1820_s20, 3  ;;  %p2271_p9 = scmp.eq.s32.totalorder %s1920_s21, 0 }
  0x14   : > { %s1822_s30 = smov [#allocation2]   ;;  %s1694_s16 = scalar_lea.hbm %s2263_s4, 16 }
  0x15   : > { %p1948_p10 = pnand %p1434_p7, %p311_p8  ;;  %s327_s12 = sshll.u32 %s1822_s30, 4  ;;  %s328_s12 = int_to_ptr.vmem [resolvable:$true] %s327_s12 }
  0x16   : > { %p1695_p13 = scmp.ne.s32.totalorder %s2263_s4, %s1694_s16  ;;  %p1701_p3 = scmp.lt.u32.totalorder %s1694_s16, %s2263_s4 }
  0x17   : > { %s2280_s29 = scalar_select %p1948_p10, 1, 0 }
  0x18   : > { %p1601_p11 = pneg %p1948_p10 }
  0x1a   : > { %p1956_p12 = pnand %p2271_p9, %p1601_p11 }
  0x1c   : > { %p1696_p0 = pneg %p1956_p12 }
  0x1e   : > { %p1697_p1 = pnand %p1696_p0, %p1695_p13 }
  0x20   : > { %p1698_p2 = pneg %p1697_p1 }
  0x22   : > { %p1703_p4 = pnand %p1701_p3, %p1698_p2 }
  0x24   : > { %1706 = shalt.err (!%p1703_p4)
}
  0x25   : > { %s1707_s26 = scalar_lea.vmem %s328_s12, 16  ;;  %s1714_s14 = scalar_lea.vmem %s328_s12, 32 }
  0x26   : > { %p1708_p7 = scmp.ne.s32.totalorder %s328_s12, %s1707_s26  ;;  %p1715_p9 = scmp.lt.s32.totalorder %s328_s12, %s328_s12 }
  0x27   : > { %p1716_p6 = scmp.lt.s32.totalorder %s1714_s14, %s1707_s26 }
  0x28   : > { %p1710_p8 = pnand %p1708_p7, %p1696_p0 }
  0x29   : > { %p1717_p5 = por %p1716_p6, %p1715_p9 }
  0x2a   : > { %p1711_p11 = pneg %p1710_p8 }
  0x2c   : > { %p1718_p10 = pnand %p1717_p5, %p1711_p11 }
  0x2e   : > { %1721 = shalt.err (!%p1718_p10)
}
  0x2f   : > { %1604 = dma.hbm_to_vmem [thread:$0]  (!%p1956_p12), %s2263_s4, 16, %s328_s12, [#allocation3]  }
  0x30   : > { %p2282_p13 = scmp.ne.s32.totalorder %s2280_s29, 0 }
  0x31   : > { %p2283_p1 = scmp.eq.s32.totalorder (!%p2282_p13), %s1920_s21, 0 }
  0x32   : > { %375 = sbr.rel (%p2282_p13) target bundleno = 2689 (0xa81), region = 60 }
  0x39   : > { %1795 = dma.done.wait (%p2283_p1), [#allocation3], 16   ;;  %p2284_p0 = pmov %p2283_p1 }
  0x3a   : > { %p426_p6 = scmp.lt.s32.totalorder %s1920_s21, 1  ;;  %v1823_v0 = vmov 0.0   ;;  %vm1824_vm0 = vmmov 0   ;;  %v1664_v1 = vld [vmem:[%s2262_s3] sm:$0xff]   ;;  %v1665_v2 = vld [vmem:[%s2262_s3 + $0x8] sm:$0xff]   ;;  %vm476_vm1 = vcmask 261120   ;;  %v439_v25 = vlaneseq }
  0x3b   : > { %1797 = vsyncadd (%p2284_p0), [#allocation3], 4294967280  ;;  %1509 = vmatprep.subr.bf16.mxu0 %v1823_v0  ;;  %1513 = vmatprep.mubr.msk.bf16.mxu0 %vm1824_vm0, %v1823_v0  ;;  %v1443_v5 = vld [vmem:[#allocation2] ss:$0 sm:$0xff]  ;;  %s1825_s15 = smov 104   ;;  %s1826_s22 = smov 120  }
  0x3c   : > { %s1987_s26 = scalar_select %p426_p6, %s1920_s21, 1  ;;  %1517 = vmatprep.subr.bf16.mxu1 %v1823_v0  ;;  %1519 = vmatprep.mubr.msk.bf16.mxu1 %vm1824_vm0, %v1823_v0  ;;  %v1827_v12 = vmov 0   ;;  %vm530_vm2 = vcmask 64512   ;;  %v445_v26 = vshrl.u32 %v439_v25, 7  ;;  %v440_v29 = vand.u32 127, %v439_v25 }
  0x3d   : > { %1510 = vmatpush3.bf16.msra.mxu0 %v1664_v1  ;;  %1662 = vset.pattern.permute.xlu1 %v1827_v12  ;;  %s1828_s12 = smov 96   ;;  %s1829_s13 = smov 112   ;;  %v1830_v31 = vmov -1e+30   ;;  %vm791_vm4 = vcmask 1043456   ;;  %vm781_vm5 = vcmask 60416  }
  0x3e   : > { %s1441_s29 = sshll.u32 %s1987_s26, 3  ;;  %1511 = vmatprep.subr.bf16.mxu0 %v1823_v0  ;;  %1663 = vset.pattern.permute.xlu0 %v1827_v12  ;;  %s2285_s0 = sld [smem:[#allocation12_spill]]  ;;  %v446_v27 = vsub.s32 0, %v445_v26  ;;  %vm995_vm6 = vcmask 130048   ;;  %vm998_vm7 = vcmask 195584   ;;  %vm1203_vm8 = vcmask 523264  }
  0x3f   : > { %s436_s16 = scalar_lea.vmem %s2261_s2, %s1441_s29  ;;  %s2274_s30 = smov 64  }
  0x40   : > { %v2004_v3 = vld [vmem:[%s436_s16] sm:$0xff]  ;;  %s2075_s14 = sand.u32 1, %s1812_s18   ;;  %s2286_s1 = sld [smem:[#allocation13_spill]] }
  0x41   : > { %v452_v4 = vpack.c.bf16 %v2004_v3, %v2004_v3  ;;  %1512 = vmatpush3.bf16.msra.mxu0 %v1665_v2  ;;  %p2287_p9 = scmp.ne.s32.totalorder %s2278_s27, 0  ;;  %s1835_s24 = smov [#allocation6]  }
  0x42   : > { %1523 = vmatprep.subr.bf16.mxu0 %v1823_v0 }
  0x44   : > { %1514 = vmatmul.mubr.msk.bf16.vlgmr.msra.gmra.mrb[0].mxu0 %vm476_vm1, %v452_v4  ;;  %s428_s25 = scalar_lea.vmem %s2285_s0, %s1987_s26  ;;  %s1281_s26 = scalar_lea.sflag [#allocation7], %s2075_s14 }
  0x45   : > { %1525 = vmatprep.mubr.msk.bf16.mxu0 %vm1824_vm0, %v1823_v0  ;;  %v438_v18 = vld [vmem:[%s428_s25] sm:$0x1]  ;;  %s1832_s25 = smov 8  }
 0x117   : > { %v514_v6 = vpop.f32.mrb[0].mxu0 }
 0x118   : > { %v515_v7 = vadd.f32 %v1443_v5, %v514_v6  ;;  %v1515_v8 = vpop.f32.mrb[1].mxu0 }
 0x119   : > { %v517_v9 = vpop.f32.mrb[2].mxu0 }
 0x11a   : > { %v2013_v10 = vpack.c.bf16 %v515_v7, %v515_v7  ;;  %v1516_v11 = vpop.f32.mrb[3].mxu0 }
 0x11c   : > { %526 = vrot.lane.b32.xlu1 %v2013_v10, %s1825_s15  ;;  %522 = vrot.lane.b32.xlu0 %v2013_v10, %s1826_s22  ;;  %s1440_s15 = sshll.u32 %s2075_s14, 4 }
 0x11d   : > { %s2079_s22 = scalar_lea.vmem [#allocation6], %s1440_s15  ;;  %s1833_s15 = smov 16  }
 0x11e   : > { %s1306_s0 = sshll.u32 %s2079_s22, 4  ;;  %s2171_s0 = int_to_ptr.vmem [resolvable:$true] %s1306_s0 }
 0x120   : > { %528 = vrot.lane.b32.xlu1 %v2013_v10, %s1828_s12  ;;  %524 = vrot.lane.b32.xlu0 %v2013_v10, %s1829_s13 }
 0x18e   : > { %v2019_v13 = vpop.permute.xlu1 %526  ;;  %v2021_v14 = vpop.permute.xlu0 %522 }
 0x18f   : > { %577 = vrot.lane.b32.xlu0 %v2021_v14, %s1828_s12 }
 0x192   : > { %v529_v15 = vpop.permute.xlu1 %528  ;;  %v2028_v16 = vpop.permute.xlu0 %524 }
 0x193   : > { %673 = vrot.lane.b32.xlu0 %v2019_v13, %s1828_s12  ;;  %625 = vrot.lane.b32.xlu1 %v2028_v16, %s1828_s12  ;;  %v535_v17 = vsel %vm530_vm2, %v529_v15, 0  ;;  %s1834_s12 = smov 24  }
 0x194   : > { %1518 = vmatpush3.bf16.xpose.msra.mxu1 %v535_v17 }
 0x195   : > { %1529 = vmatprep.subr.bf16.mxu1 %v1823_v0 }
 0x197   : > { %442 = vperm.xlu1 %1662, %v438_v18  }
 0x19b   : > { %1520 = vmatmul.mubr.msk.bf16.vlgmr.msra.gmra.mrb[0].mxu1 %vm530_vm2, %v2013_v10 }
 0x19c   : > { %1531 = vmatprep.mubr.msk.bf16.mxu1 %vm1824_vm0, %v1823_v0 }
 0x201   : > { %v578_v19 = vpop.permute.xlu0 %577 }
 0x202   : > { %v583_v20 = vsel %vm530_vm2, %v578_v19, 0 }
 0x203   : > { %1524 = vmatpush3.bf16.xpose.msra.mxu0 %v583_v20 }
 0x204   : > { %1535 = vmatprep.subr.bf16.mxu0 %v1823_v0 }
 0x205   : > { %v626_v21 = vpop.permute.xlu1 %625  ;;  %v674_v23 = vpop.permute.xlu0 %673 }
 0x206   : > { %v631_v22 = vsel %vm530_vm2, %v626_v21, 0  ;;  %v679_v24 = vsel %vm530_vm2, %v674_v23, 0 }
 0x207   : > { %1530 = vmatpush3.bf16.xpose.msra.mxu1 %v631_v22 }
 0x208   : > { %1541 = vmatprep.subr.bf16.mxu1 %v1823_v0 }
 0x20a   : > { %1526 = vmatmul.mubr.msk.bf16.vlgmr.msra.gmra.mrb[4].mxu0 %vm530_vm2, %v2021_v14 }
 0x20b   : > { %1536 = vmatpush3.bf16.xpose.msra.mxu0 %v679_v24  ;;  %1537 = vmatprep.mubr.msk.bf16.mxu0 %vm1824_vm0, %v1823_v0 }
 0x20c   : > { %1547 = vmatprep.subr.bf16.mxu0 %v1823_v0 }
 0x20e   : > { %1532 = vmatmul.mubr.msk.bf16.vlgmr.msra.gmra.mrb[4].mxu1 %vm530_vm2, %v2028_v16 }
 0x20f   : > { %1543 = vmatprep.mubr.msk.bf16.mxu1 %vm1824_vm0, %v1823_v0 }
 0x212   : > { %1538 = vmatmul.mubr.msk.bf16.vlgmr.msra.gmra.mrb[8].mxu0 %vm530_vm2, %v2019_v13 }
 0x213   : > { %1549 = vmatprep.mubr.msk.bf16.mxu0 %vm1824_vm0, %v1823_v0 }
 0x216   : > { %v443_v28 = vpop.permute.xlu1 %442 }
 0x217   : > { %v447_v30 = vrot.slane %v443_v28, %v446_v27 }
 0x219   : > { %vm448_vm3 = vcmp.lt.s32.totalorder %v440_v29, %v447_v30 }
 0x21a   : > { %v449_v32 = vsel %vm448_vm3, 0.0, %v1830_v31 }
 0x21b   : > { %v728_v33 = vrot.slane %v449_v32, %v446_v27 }
 0x26e   : > { %v571_v34 = vpop.f32.mrb[0].mxu1 }
 0x26f   : > { %v721_v35 = vmul.f32 0.35355338, %v571_v34  ;;  %v1521_v36 = vpop.f32.mrb[1].mxu1 }
 0x270   : > { %v574_v37 = vpop.f32.mrb[2].mxu1 }
 0x271   : > { %v1522_v38 = vpop.f32.mrb[3].mxu1  ;;  %v729_v39 = vadd.f32 %v728_v33, %v721_v35 }
 0x273   : > { %v733_v40 = vsel %vm530_vm2, %v729_v39, -inf }
 0x274   : > { %734 = vmax.xlane.f32.xlu0 %v733_v40 }
 0x2dd   : > { %v619_v41 = vpop.f32.mrb[4].mxu0 }
 0x2de   : > { %v722_v42 = vmul.f32 0.35355338, %v619_v41  ;;  %v1527_v43 = vpop.f32.mrb[5].mxu0 }
 0x2df   : > { %v622_v44 = vpop.f32.mrb[6].mxu0 }
 0x2e0   : > { %v1528_v45 = vpop.f32.mrb[7].mxu0  ;;  %v730_v46 = vadd.f32 %v728_v33, %v722_v42 }
 0x2e1   : > { %v667_v47 = vpop.f32.mrb[4].mxu1 }
 0x2e2   : > { %v723_v48 = vmul.f32 0.35355338, %v667_v47  ;;  %v1533_v49 = vpop.f32.mrb[5].mxu1  ;;  %v736_v50 = vsel %vm530_vm2, %v730_v46, -inf }
 0x2e3   : > { %v670_v51 = vpop.f32.mrb[6].mxu1  ;;  %737 = vmax.xlane.f32.xlu1 %v736_v50  ;;  %v1667_v49 = vld [vmem:[%s2264_s5 + $0x8] sm:$0xff]  }
 0x2e4   : > { %v1534_v52 = vpop.f32.mrb[7].mxu1  ;;  %v731_v53 = vadd.f32 %v728_v33, %v723_v48  ;;  %v1666_v48 = vld [vmem:[%s2264_s5] sm:$0xff]  }
 0x2e5   : > { %v715_v54 = vpop.f32.mrb[8].mxu0 }
 0x2e6   : > { %v724_v55 = vmul.f32 0.35355338, %v715_v54  ;;  %v1539_v56 = vpop.f32.mrb[9].mxu0  ;;  %v739_v57 = vsel %vm530_vm2, %v731_v53, -inf }
 0x2e7   : > { %v718_v58 = vpop.f32.mrb[10].mxu0  ;;  %740 = vmax.xlane.f32.xlu0 %v739_v57 }
 0x2e8   : > { %v1540_v59 = vpop.f32.mrb[11].mxu0  ;;  %v732_v60 = vadd.f32 %v728_v33, %v724_v55 }
 0x2ea   : > { %v742_v61 = vsel %vm530_vm2, %v732_v60, -inf }
 0x2eb   : > { %743 = vmax.xlane.f32.xlu0 %v742_v61 }
 0x2f4   : > { %786 = vrot.lane.b32.xlu1 %v2013_v10, %s2274_s30 }
 0x301   : > { %v735_v62 = vpop.xlane.xlu0 %734 }
 0x302   : > { %v745_v63 = vsub.f32 %v729_v39, %v735_v62 }
 0x304   : > { %v749_v1 = vmul.f32 1.442695, %v745_v63 }
 0x306   : > { %1674 = vpow2.f32 %v749_v1 }
 0x310   : > { %v1675_v2 = vpop.eup %1674 }
 0x311   : > { %v757_v4 = vsel %vm530_vm2, %v1675_v2, 0.0 }
 0x318   : > { %758 = vadd.xlane.f32.xlu1 %v757_v4 }
 0x370   : > { %v738_v5 = vpop.xlane.xlu1 %737 }
 0x371   : > { %v746_v6 = vsub.f32 %v730_v46, %v738_v5 }
 0x373   : > { %v751_v7 = vmul.f32 1.442695, %v746_v6 }
 0x374   : > { %v787_v8 = vpop.permute.xlu1 %786  ;;  %v741_v9 = vpop.xlane.xlu0 %740 }
 0x375   : > { %1676 = vpow2.f32 %v751_v7  ;;  %v793_v11 = vsel %vm791_vm4, %v787_v8, 0  ;;  %v747_v12 = vsub.f32 %v731_v53, %v741_v9 }
 0x376   : > { %1542 = vmatpush3.bf16.msra.mxu1 %v793_v11  ;;  %v1455_v11 = vld [vmem:[%s2268_s9] ss:$0 sm:$0xff] }
 0x377   : > { %v753_v10 = vmul.f32 1.442695, %v747_v12  ;;  %1553 = vmatprep.subr.bf16.mxu1 %v1823_v0 }
 0x378   : > { %v744_v15 = vpop.xlane.xlu0 %743 }
 0x379   : > { %1678 = vpow2.f32 %v753_v10  ;;  %v748_v17 = vsub.f32 %v732_v60, %v744_v15 }
 0x37b   : > { %v755_v18 = vmul.f32 1.442695, %v748_v17 }
 0x37d   : > { %1680 = vpow2.f32 %v755_v18 }
 0x37f   : > { %v1677_v19 = vpop.eup %1676 }
 0x380   : > { %v760_v20 = vsel %vm530_vm2, %v1677_v19, 0.0 }
 0x381   : > { %761 = vadd.xlane.f32.xlu0 %v760_v20 }
 0x383   : > { %v1679_v21 = vpop.eup %1678 }
 0x384   : > { %v763_v22 = vsel %vm530_vm2, %v1679_v21, 0.0 }
 0x385   : > { %764 = vadd.xlane.f32.xlu1 %v763_v22 }
 0x387   : > { %v1681_v23 = vpop.eup %1680 }
 0x388   : > { %v766_v24 = vsel %vm530_vm2, %v1681_v23, 0.0 }
 0x389   : > { %767 = vadd.xlane.f32.xlu0 %v766_v24 }
 0x396   : > { %883 = vrot.lane.b32.xlu1 %v2028_v16, %s2274_s30 }
 0x39a   : > { %931 = vrot.lane.b32.xlu1 %v2019_v13, %s2274_s30 }
 0x39f   : > { %835 = vrot.lane.b32.xlu0 %v2021_v14, %s2274_s30  ;;  %s1726_s30 = sshll.u32 %s1835_s24, 4  ;;  %s1727_s30 = int_to_ptr.vmem [resolvable:$false] %s1726_s30 }
 0x3a0   : > { %p1729_p2 = scmp.lt.s32.totalorder %s2171_s0, %s1727_s30 }
 0x3a5   : > { %v759_v25 = vpop.xlane.xlu1 %758 }
 0x3a6   : > { %1682 = vrcp.f32 %v759_v25 }
 0x3b0   : > { %v1683_v26 = vpop.eup %1682 }
 0x3b1   : > { %v773_v27 = vmul.f32 %v1683_v26, %v1675_v2  ;;  %v1668_v26 = vld [vmem:[%s2265_s6] sm:$0xff]  }
 0x3b3   : > { %v777_v28 = vpack.c.bf16 %v773_v27, %v773_v27  ;;  %v1669_v27 = vld [vmem:[%s2265_s6 + $0x8] sm:$0xff]  }
 0x3b5   : > { %1544 = vmatmul.mubr.msk.bf16.vlgmr.msra.gmra.mrb[8].mxu1 %vm530_vm2, %v777_v28  ;;  %782 = vst.msk [vmem:[%s2079_s22] sm:$0xf] %vm781_vm5, %v777_v28  ;;  %v1670_v28 = vld [vmem:[%s2267_s8] sm:$0xff]  }
 0x3b6   : > { %1555 = vmatprep.mubr.msk.bf16.mxu1 %vm1824_vm0, %v1823_v0 }
 0x40e   : > { %v762_v13 = vpop.xlane.xlu0 %761 }
 0x40f   : > { %1684 = vrcp.f32 %v762_v13  ;;  %v1671_v13 = vld [vmem:[%s2267_s8 + $0x8] sm:$0xff]  }
 0x412   : > { %v765_v14 = vpop.xlane.xlu1 %764 }
 0x413   : > { %1686 = vrcp.f32 %v765_v14 }
 0x416   : > { %v884_v16 = vpop.permute.xlu1 %883  ;;  %v768_v29 = vpop.xlane.xlu0 %767 }
 0x417   : > { %v889_v30 = vsel %vm791_vm4, %v884_v16, 0  ;;  %1688 = vrcp.f32 %v768_v29 }
 0x418   : > { %1554 = vmatpush3.bf16.msra.mxu1 %v889_v30 }
 0x419   : > { %v1685_v31 = vpop.eup %1684  ;;  %1565 = vmatprep.subr.bf16.mxu1 %v1823_v0 }
 0x41a   : > { %v774_v32 = vmul.f32 %v1685_v31, %v1677_v19  ;;  %v836_v33 = vpop.permute.xlu0 %835  ;;  %v932_v35 = vpop.permute.xlu1 %931  ;;  %v1459_v31 = vld [vmem:[%s2268_s9 + $0x1] ss:$0 sm:$0xff] }
 0x41b   : > { %v841_v34 = vsel %vm791_vm4, %v836_v33, 0  ;;  %v937_v39 = vsel %vm791_vm4, %v932_v35, 0  ;;  %v1460_v33 = vld [vmem:[%s2268_s9 + $0x2] ss:$0 sm:$0xff] }
 0x41c   : > { %1548 = vmatpush3.bf16.msra.mxu0 %v841_v34  ;;  %v778_v36 = vpack.c.bf16 %v774_v32, %v774_v32 }
 0x41d   : > { %v1687_v37 = vpop.eup %1686  ;;  %1559 = vmatprep.subr.bf16.mxu0 %v1823_v0 }
 0x41e   : > { %v775_v38 = vmul.f32 %v1687_v37, %v1679_v21  ;;  %783 = vst.msk [vmem:[%s2079_s22 + $0x4] sm:$0xf] %vm781_vm5, %v778_v36 }
 0x41f   : > { %1550 = vmatmul.mubr.msk.bf16.vlgmr.msra.gmra.mrb[12].mxu0 %vm530_vm2, %v778_v36 }
 0x420   : > { %1560 = vmatpush3.bf16.msra.mxu0 %v937_v39  ;;  %v779_v40 = vpack.c.bf16 %v775_v38, %v775_v38  ;;  %1561 = vmatprep.mubr.msk.bf16.mxu0 %vm1824_vm0, %v1823_v0  ;;  %v1672_v39 = vld [vmem:[%s2267_s8 + $0x10] sm:$0xff]  }
 0x421   : > { %v1689_v41 = vpop.eup %1688  ;;  %1573 = vmatprep.subr.bf16.mxu0 %v1823_v0 }
 0x422   : > { %v776_v42 = vmul.f32 %v1689_v41, %v1681_v23  ;;  %1556 = vmatmul.mubr.msk.bf16.vlgmr.msra.gmra.mrb[12].mxu1 %vm530_vm2, %v779_v40  ;;  %784 = vst.msk [vmem:[%s2079_s22 + $0x8] sm:$0xf] %vm781_vm5, %v779_v40  ;;  %v1673_v40 = vld [vmem:[%s2267_s8 + $0x18] sm:$0xff]   ;;  %v1461_v41 = vld [vmem:[%s2266_s7] ss:$0 sm:$0xff] }
 0x423   : > { %1569 = vmatprep.mubr.msk.bf16.mxu1 %vm1824_vm0, %v1823_v0  ;;  %1566 = vmatpush3.bf16.msra.mxu1 %v1666_v48 }
 0x424   : > { %v780_v43 = vpack.c.bf16 %v776_v42, %v776_v42  ;;  %1567 = vmatprep.subr.bf16.mxu1 %v1823_v0 }
 0x426   : > { %785 = vst.msk [vmem:[%s2079_s22 + $0xc] sm:$0xf] %vm781_vm5, %v780_v43  ;;  %s1728_s22 = scalar_lea.vmem %s1727_s30, 512 }
 0x427   : > { %1562 = vmatmul.mubr.msk.bf16.vlgmr.msra.gmra.mrb[16].mxu0 %vm530_vm2, %v780_v43  ;;  %1568 = vmatpush3.bf16.msra.mxu1 %v1667_v49 }
 0x428   : > { %1577 = vmatprep.mubr.msk.bf16.mxu0 %vm1824_vm0, %v1823_v0  ;;  %1581 = vmatprep.subr.bf16.mxu1 %v1823_v0 }
 0x429   : > { %1574 = vmatpush3.bf16.msra.mxu0 %v1668_v26 }
 0x42a   : > { %1575 = vmatprep.subr.bf16.mxu0 %v1823_v0 }
 0x42d   : > { %1576 = vmatpush3.bf16.msra.mxu0 %v1669_v27 }
 0x488   : > { %v829_v44 = vpop.f32.mrb[8].mxu1 }
 0x489   : > { %v1545_v45 = vpop.f32.mrb[9].mxu1  ;;  %v979_v4 = vpack.c.bf16 %v829_v44, %v829_v44 }
 0x48a   : > { %v832_v46 = vpop.f32.mrb[10].mxu1 }
 0x48b   : > { %v1546_v47 = vpop.f32.mrb[11].mxu1 }
 0x4f2   : > { %v877_v50 = vpop.f32.mrb[12].mxu0 }
 0x4f3   : > { %v980_v51 = vpack.c.bf16 %v877_v50, %v877_v50  ;;  %v1551_v52 = vpop.f32.mrb[13].mxu0 }
 0x4f4   : > { %v880_v53 = vpop.f32.mrb[14].mxu0 }
 0x4f5   : > { %v925_v54 = vpop.f32.mrb[12].mxu1  ;;  %984 = vrot.lane.b32.xlu0 %v980_v51, %s1832_s25  ;;  %v1552_v55 = vpop.f32.mrb[15].mxu0 }
 0x4f6   : > { %v981_v56 = vpack.c.bf16 %v925_v54, %v925_v54  ;;  %v1557_v57 = vpop.f32.mrb[13].mxu1 }
 0x4f7   : > { %v928_v58 = vpop.f32.mrb[14].mxu1 }
 0x4f8   : > { %987 = vrot.lane.b32.xlu1 %v981_v56, %s1833_s15  ;;  %v1558_v59 = vpop.f32.mrb[15].mxu1  ;;  %s432_s15 = scalar_lea.vmem %s2286_s1, %s1441_s29  ;;  %s1722_s29 = scalar_lea.vmem %s2171_s0, 256 }
 0x4f9   : > { %p1723_p5 = scmp.ne.s32.totalorder %s2171_s0, %s1722_s29  ;;  %p1730_p3 = scmp.lt.s32.totalorder %s1728_s22, %s1722_s29 }
 0x4fa   : > { %v973_v60 = vpop.f32.mrb[16].mxu0 }
 0x4fb   : > { %v982_v61 = vpack.c.bf16 %v973_v60, %v973_v60  ;;  %v1563_v62 = vpop.f32.mrb[17].mxu0  ;;  %p1724_p10 = pnand %p1723_p5, %p2287_p9  ;;  %p1731_p4 = por %p1730_p3, %p1729_p2 }
 0x4fc   : > { %v976_v63 = vpop.f32.mrb[18].mxu0 }
 0x4fd   : > { %990 = vrot.lane.b32.xlu0 %v982_v61, %s1834_s12  ;;  %v1564_v1 = vpop.f32.mrb[19].mxu0  ;;  %p1725_p12 = pneg %p1724_p10 }
 0x4ff   : > { %p1732_p7 = pnand %p1731_p4, %p1725_p12 }
 0x567   : > { %v985_v2 = vpop.permute.xlu0 %984 }
 0x568   : > { %v994_v6 = vsel %vm530_vm2, %v979_v4, %v985_v2 }
 0x56a   : > { %v988_v5 = vpop.permute.xlu1 %987 }
 0x56b   : > { %v997_v7 = vsel %vm995_vm6, %v994_v6, %v988_v5 }
 0x56f   : > { %v991_v8 = vpop.permute.xlu0 %990 }
 0x570   : > { %v1000_v9 = vsel %vm998_vm7, %v997_v7, %v991_v8 }
 0x571   : > { %1570 = vmatmul.mubr.msk.bf16.vlgmr.msra.gmra.mrb[16].mxu1 %vm476_vm1, %v1000_v9 }
 0x572   : > { %1589 = vmatprep.mubr.msk.bf16.mxu1 %vm1824_vm0, %v1823_v0  ;;  %1582 = vmatpush3.bf16.msra.mxu1 %v1670_v28 }
 0x573   : > { %1583 = vmatprep.subr.bf16.mxu1 %v1823_v0 }
 0x576   : > { %1584 = vmatpush3.bf16.msra.mxu1 %v1671_v13 }
 0x577   : > { %1585 = vmatprep.subr.bf16.mxu1 %v1823_v0 }
 0x57a   : > { %1586 = vmatpush3.bf16.msra.mxu1 %v1672_v39 }
 0x57b   : > { %1587 = vmatprep.subr.bf16.mxu1 %v1823_v0  ;;  %v1465_v0 = vld [vmem:[%s2268_s9 + $0x3] ss:$0 sm:$0xff] }
 0x57e   : > { %1588 = vmatpush3.bf16.msra.mxu1 %v1673_v40 }
 0x644   : > { %v1058_v12 = vpop.f32.mrb[16].mxu1 }
 0x645   : > { %v1059_v10 = vadd.f32 %v1455_v11, %v1058_v12  ;;  %v1571_v15 = vpop.f32.mrb[17].mxu1 }
 0x646   : > { %v1061_v17 = vpop.f32.mrb[18].mxu1 }
 0x647   : > { %v1572_v18 = vpop.f32.mrb[19].mxu1  ;;  %v1064_v19 = vadd.f32 %v1059_v10, %v2004_v3  ;;  %v450_v3 = vld [vmem:[%s432_s15] sm:$0xff]  ;;  %s1476_s15 = sshll.u32 %s1920_s21, 6 }
 0x648   : > { %s2176_s16 = scalar_lea.hbm %s2270_s11, %s1476_s15 }
 0x649   : > { %v1067_v20 = vsel %vm476_vm1, %v1064_v19, 0.0 }
 0x64a   : > { %1068 = vadd.xlane.f32.xlu1 %v1067_v20 }
 0x6d7   : > { %v1069_v21 = vpop.xlane.xlu1 %1068 }
 0x6d8   : > { %v1071_v22 = vmul.f32 0.03125, %v1069_v21 }
 0x6da   : > { %v1072_v23 = vsub.f32 %v1064_v19, %v1071_v22 }
 0x6dc   : > { %v1073_v24 = vmul.f32 %v1072_v23, %v1072_v23 }
 0x6de   : > { %v1074_v25 = vsel %vm476_vm1, %v1073_v24, 0.0 }
 0x6df   : > { %1075 = vadd.xlane.f32.xlu0 %v1074_v25 }
 0x6f5   : > { %1093 = vperm.xlu0 %1663, %v450_v3  }
 0x76c   : > { %v1076_v14 = vpop.xlane.xlu0 %1075 }
 0x76d   : > { %v1077_v16 = vmul.f32 0.03125, %v1076_v14 }
 0x76f   : > { %v1078_v29 = vadd.f32 1e-05, %v1077_v16 }
 0x771   : > { %1690 = vrsqrt.f32 %v1078_v29 }
 0x774   : > { %v2150_v35 = vpop.permute.xlu0 %1093 }
 0x77b   : > { %v1691_v30 = vpop.eup %1690 }
 0x77c   : > { %v1080_v32 = vmul.f32 %v1691_v30, %v1072_v23 }
 0x77e   : > { %v1085_v34 = vmul.f32 %v1459_v31, %v1080_v32 }
 0x780   : > { %v1090_v36 = vadd.f32 %v1460_v33, %v1085_v34 }
 0x782   : > { %v1096_v37 = vmul.f32 %v2150_v35, %v1090_v36 }
 0x784   : > { %v1097_v38 = vpack.c.bf16 %v1096_v37, %v1096_v37 }
 0x786   : > { %1578 = vmatmul.mubr.msk.bf16.vlgmr.msra.gmra.mrb[20].mxu0 %vm476_vm1, %v1097_v38 }
 0x859   : > { %v1158_v42 = vpop.f32.mrb[20].mxu0 }
 0x85a   : > { %v1159_v43 = vadd.f32 %v1461_v41, %v1158_v42  ;;  %v1579_v44 = vpop.f32.mrb[21].mxu0 }
 0x85b   : > { %v1161_v45 = vpop.f32.mrb[22].mxu0 }
 0x85c   : > { %v1164_v46 = vmax.f32 %v1159_v43, 0.0  ;;  %v1580_v47 = vpop.f32.mrb[23].mxu0 }
 0x85e   : > { %v1165_v48 = vpack.c.bf16 %v1164_v46, %v1164_v46 }
 0x860   : > { %1590 = vmatmul.mubr.msk.bf16.vlgmr.msra.gmra.mrb[20].mxu1 %vm1203_vm8, %v1165_v48 }
 0x933   : > { %v1241_v49 = vpop.f32.mrb[20].mxu1 }
 0x934   : > { %v1242_v50 = vadd.f32 %v1465_v0, %v1241_v49  ;;  %v1591_v51 = vpop.f32.mrb[21].mxu1 }
 0x935   : > { %v1244_v52 = vpop.f32.mrb[22].mxu1 }
 0x936   : > { %v1592_v53 = vpop.f32.mrb[23].mxu1  ;;  %v1247_v54 = vadd.f32 %v1242_v50, %v1096_v37 }
 0x938   : > { %v1250_v55 = vsel %vm476_vm1, %v1247_v54, 0.0 }
 0x939   : > { %1251 = vadd.xlane.f32.xlu1 %v1250_v55 }
 0x9c6   : > { %v1252_v56 = vpop.xlane.xlu1 %1251 }
 0x9c7   : > { %v1253_v57 = vmul.f32 0.03125, %v1252_v56 }
 0x9c9   : > { %v1254_v58 = vsub.f32 %v1247_v54, %v1253_v57 }
 0x9cb   : > { %v1255_v59 = vmul.f32 %v1254_v58, %v1254_v58 }
 0x9cd   : > { %v1256_v60 = vsel %vm476_vm1, %v1255_v59, 0.0 }
 0x9ce   : > { %1257 = vadd.xlane.f32.xlu1 %v1256_v60 }
 0x9cf   : > { %1735 = shalt.err (!%p1732_p7)
}
 0x9d0   : > { %s1736_s25 = scalar_lea.hbm %s2176_s16, 256  ;;  %s1740_s13 = scalar_lea.hbm %s2270_s11, 512 }
 0x9d1   : > { %p1737_p8 = scmp.ne.s32.totalorder %s2176_s16, %s1736_s25  ;;  %p1741_p1 = scmp.lt.u32.totalorder %s2176_s16, %s2270_s11 }
 0x9d2   : > { %p1742_p0 = scmp.lt.u32.totalorder %s1740_s13, %s1736_s25  ;;  %p1744_p5 = scmp.lt.u32.totalorder %s1736_s25, %s2176_s16 }
 0x9d3   : > { %p1738_p11 = pnand %p1737_p8, %p2287_p9 }
 0x9d4   : > { %p1743_p6 = por %p1742_p0, %p1741_p1 }
 0x9d5   : > { %p1739_p13 = pneg %p1738_p11 }
 0x9d6   : > { %p1745_p10 = por %p1744_p5, %p1743_p6 }
 0x9d8   : > { %p1746_p12 = pnand %p1745_p10, %p1739_p13 }
 0x9da   : > { %1749 = shalt.err (!%p1746_p12)
}
 0x9db   : > { %s1836_s29 = smov 128   ;;  %s1837_s22 = smov 4   ;;  %v1471_v2 = vld [vmem:[%s2268_s9 + $0x4] ss:$0 sm:$0xff]  ;;  %v1472_v5 = vld [vmem:[%s2268_s9 + $0x5] ss:$0 sm:$0xff] }
 0x9dc   : > { %s2288_s15 = smov 64   ;;  %s1439_s25 = sshll.u32 %s2075_s14, 3 }
 0x9dd   : > { %1598 = dma.vmem_to_hbm [thread:$0]  (%p2287_p9), %s2171_s0, 256, %s2176_s16, %s1281_s26, %s2288_s15, %s1836_s29, %s1837_s22  }
 0x9de   : > { %s1475_s1 = sshll.u32 %s1920_s21, 7  ;;  %s418_s0 = scalar_lea.vmem [#allocation5], %s1439_s25 }
 0x9df   : > { %s1294_s16 = sshll.u32 %s418_s0, 4  ;;  %s2215_s22 = scalar_lea.hbm %s2269_s10, %s1475_s1  ;;  %s2217_s16 = int_to_ptr.vmem [resolvable:$true] %s1294_s16 }
 0x9e0   : > { %s1276_s15 = scalar_lea.sflag [#allocation4], %s2075_s14  ;;  %s1750_s12 = scalar_lea.vmem %s2217_s16, 128 }
 0x9e1   : > { %p1751_p2 = scmp.ne.s32.totalorder %s2217_s16, %s1750_s12  ;;  %s1838_s21 = smov [#allocation5]  }
 0x9e2   : > { %s1754_s25 = sshll.u32 %s1838_s21, 4  ;;  %s1755_s25 = int_to_ptr.vmem [resolvable:$false] %s1754_s25 }
 0x9e3   : > { %p1752_p3 = pnand %p1751_p2, %p2287_p9  ;;  %s1756_s13 = scalar_lea.vmem %s1755_s25, 256 }
 0x9e4   : > { %p1757_p7 = scmp.lt.s32.totalorder %s2217_s16, %s1755_s25  ;;  %p1758_p8 = scmp.lt.s32.totalorder %s1756_s13, %s1750_s12 }
 0x9e5   : > { %p1753_p4 = pneg %p1752_p3 }
 0x9e6   : > { %p1759_p11 = por %p1758_p8, %p1757_p7 }
 0x9e8   : > { %p1760_p13 = pnand %p1759_p11, %p1753_p4 }
 0xa5b   : > { %v1258_v61 = vpop.xlane.xlu1 %1257 }
 0xa5c   : > { %v1259_v62 = vmul.f32 0.03125, %v1258_v61 }
 0xa5e   : > { %v1260_v63 = vadd.f32 1e-05, %v1259_v62 }
 0xa60   : > { %1692 = vrsqrt.f32 %v1260_v63 }
 0xa6a   : > { %v1693_v1 = vpop.eup %1692 }
 0xa6b   : > { %v1262_v4 = vmul.f32 %v1693_v1, %v1254_v58 }
 0xa6d   : > { %v1267_v6 = vmul.f32 %v1471_v2, %v1262_v4 }
 0xa6f   : > { %v1272_v7 = vadd.f32 %v1472_v5, %v1267_v6 }
 0xa71   : > { %v1273_v8 = vmul.f32 %v1272_v7, %v2150_v35 }
 0xa73   : > { %1274 = vst.msk [vmem:[%s418_s0] sm:$0xff] %vm476_vm1, %v1273_v8 }
 0xa74   : > { %1763 = shalt.err (!%p1760_p13)
}
 0xa75   : > { %s1764_s1 = scalar_lea.hbm %s2215_s22, 128  ;;  %s1768_s30 = scalar_lea.hbm %s2269_s10, 256 }
 0xa76   : > { %p1765_p1 = scmp.ne.s32.totalorder %s2215_s22, %s1764_s1  ;;  %p1769_p5 = scmp.lt.u32.totalorder %s2215_s22, %s2269_s10 }
 0xa77   : > { %p1770_p10 = scmp.lt.u32.totalorder %s1768_s30, %s1764_s1  ;;  %p1772_p2 = scmp.lt.u32.totalorder %s1764_s1, %s2215_s22 }
 0xa78   : > { %p1766_p0 = pnand %p1765_p1, %p2287_p9 }
 0xa79   : > { %p1771_p12 = por %p1770_p10, %p1769_p5 }
 0xa7a   : > { %p1767_p6 = pneg %p1766_p0 }
 0xa7b   : > { %p1773_p3 = por %p1772_p2, %p1771_p12 }
 0xa7d   : > { %p1774_p4 = pnand %p1773_p3, %p1767_p6 }
 0xa7f   : > { %1777 = shalt.err (!%p1774_p4)
}
 0xa80   : > { %1597 = dma.vmem_to_hbm [thread:$0]  (%p2287_p9), %s2217_s16, 128, %s2215_s22, %s1276_s15  }
 0xa81 PF: > { %p1614_p7 = scmp.ge.s32.totalorder %s1820_s20, 2  ;;  %s1321_s29 = sand.u32 1, %s1808_s17  }
 0xa82   : > { %p2289_p8 = scmp.ne.s32.totalorder %s2279_s28, 0  ;;  %s1322_s12 = scalar_lea.sflag [#allocation4], %s1321_s29 }
 0xa84   : > { %p1606_p11 = pnand %p1614_p7, %p2289_p8 }
 0xa86   : > { %1799 = dma.done.wait (!%p1606_p11), %s1322_s12, 128  }
 0xa87   : > { %1801 = vsyncadd (!%p1606_p11), %s1322_s12, 4294967168  ;;  %s1331_s21 = scalar_lea.sflag [#allocation7], %s1321_s29 }
 0xa88   : > { %1803 = dma.done.wait (!%p1606_p11), %s1331_s21, 256  }
 0xa89   : > { %1805 = vsyncadd (!%p1606_p11), %s1331_s21, 4294967040  ;;  %s2290_s27 = sld [smem:[#allocation11_spill]]  ;;  %p26_p9 = scmp.ge.s32.totalorder %s1924_s23, 4  }
 0xa8a   : > { %s2291_s17 = smov %s1812_s18  ;;  %s2292_s18 = smov %s1816_s19 }
 0xa8b   : > { %s2294_s20 = smov %s1924_s23  ;;  %28 = sbr.rel (!%p26_p9) target bundleno = 9 (0x9), region = 123 }
 0xa8f   : > { %s2293_s19 = smov %s2290_s27 }
 0xa92   :  { %1336 = vsyncpa [#allocation3], 1 }
 0xa93   :  { %1338 = vsyncpa [#allocation3 + $0x1], 1 }
 0xa94   :  { %1339 = vsyncpa [#allocation4], 1 }
 0xa95   :  { %1341 = vsyncpa [#allocation4 + $0x1], 1 }
 0xa96   :  { %1342 = vsyncpa [#allocation7], 1 }
 0xa97   :  { %1344 = vsyncpa [#allocation7 + $0x1], 1 }

</bundles_post_ra>
